<compile_context>
chip_gen: v6e
topology: v6e:2x2x1
jax: 0.10.0
libtpu: 0.0.40
codegen_flags: <defaults>
</compile_context>

<pallas_src>
import functools

import jax
import jax.numpy as jnp
from jax.experimental import pallas as pl
from jax.experimental.pallas import tpu as pltpu

HID1 = 128   # fc1 output features
HID2 = 64    # fc2 output features
LANE = 128   # TPU lane width; every slab section is padded to 128 lanes


def _rup(x, m):
    return (x + m - 1) // m * m


def _slab_offsets(d_flat):
    """Static row offsets of each parameter section inside the packed slab."""
    d_pad = _rup(d_flat, 8)
    off_w1 = 0                      # [d_pad, 128]   fc1 weight (rows >= d_flat are 0)
    off_b1 = d_pad                  # [8,    128]    fc1 bias (row 0)
    off_w2 = off_b1 + 8             # [128,  128]    fc2 weight (cols >= 64 are 0)
    off_b2 = off_w2 + HID1          # [8,    128]    fc2 bias (row 0)
    off_w3 = off_b2 + 8             # [64,   128]    out weight (cols >= A are 0)
    off_b3 = off_w3 + HID2          # [8,    128]    out bias (row 0)
    rows = off_b3 + 8
    return off_w1, off_b1, off_w2, off_b2, off_w3, off_b3, rows


def pack_params(params, d_flat):
    """Pack fc1/fc2/out weights + biases into one zero-padded f32 slab.

    Weights must already be stored [in, out] (transposed from PyTorch
    nn.Linear's [out, in]); shapes are asserted to catch misuse.  Zero padding
    keeps the padded hidden / output columns exactly zero through relu and the
    final matmul, so correctness is unaffected.
    """
    A = params['out_w'].shape[1]
    assert params['fc1_w'].shape == (d_flat, HID1), params['fc1_w'].shape
    assert params['fc1_b'].shape == (HID1,), params['fc1_b'].shape
    assert params['fc2_w'].shape == (HID1, HID2), params['fc2_w'].shape
    assert params['fc2_b'].shape == (HID2,), params['fc2_b'].shape
    assert params['out_w'].shape == (HID2, A), params['out_w'].shape
    assert params['out_b'].shape == (A,), params['out_b'].shape
    assert A <= LANE, "dim_action must fit in one 128-lane tile"

    off_w1, off_b1, off_w2, off_b2, off_w3, off_b3, rows = _slab_offsets(d_flat)
    slab = jnp.zeros((rows, LANE), jnp.float32)
    slab = slab.at[off_w1:off_w1 + d_flat, :HID1].set(params['fc1_w'].astype(jnp.float32))
    slab = slab.at[off_b1, :HID1].set(params['fc1_b'].astype(jnp.float32))
    slab = slab.at[off_w2:off_w2 + HID1, :HID2].set(params['fc2_w'].astype(jnp.float32))
    slab = slab.at[off_b2, :HID2].set(params['fc2_b'].astype(jnp.float32))
    slab = slab.at[off_w3:off_w3 + HID2, :A].set(params['out_w'].astype(jnp.float32))
    slab = slab.at[off_b3, :A].set(params['out_b'].astype(jnp.float32))
    return slab


def sxs_dqn_kernel(x_ref, p_ref, o_ref, *, d_pad):
    """One K-block of the forward pass (slab fully VMEM resident)."""
    off_w1, off_b1, off_w2, off_b2, off_w3, off_b3, _ = _slab_offsets(d_pad)

    x = x_ref[...]                                        # [tk, d_pad]

    # fc1 + relu  (pad rows of w1 / pad cols of x are zero)
    w1 = p_ref[off_w1:off_w1 + d_pad, :]                  # [d_pad, 128]
    b1 = p_ref[off_b1:off_b1 + 1, :]                      # [1, 128]
    h = jnp.dot(x, w1, preferred_element_type=jnp.float32) + b1
    h = jnp.maximum(h, 0.0)                               # [tk, 128]

    # fc2 + relu  (cols 64:128 of w2/b2 are zero -> h cols 64: stay 0)
    w2 = p_ref[off_w2:off_w2 + HID1, :]                   # [128, 128]
    b2 = p_ref[off_b2:off_b2 + 1, :]                      # [1, 128]
    h = jnp.dot(h, w2, preferred_element_type=jnp.float32) + b2
    h = jnp.maximum(h, 0.0)                               # [tk, 128]

    # out head: contract only the 64 real hidden features against a 64-row w3
    w3 = p_ref[off_w3:off_w3 + HID2, :]                   # [64, 128]
    b3 = p_ref[off_b3:off_b3 + 1, :]                      # [1, 128]
    o_ref[...] = jnp.dot(h[:, :HID2], w3,
                         preferred_element_type=jnp.float32) + b3


def sxs_dqn(x, adj, slab, dim_action, *, block_k=512):
    """Pallas forward for sxsDQN.  `adj` is accepted for signature parity with
    the PyTorch module but (exactly like the reference forward) never used."""
    del adj
    K = x.shape[0]
    x_flat = x.reshape(K, -1).astype(jnp.float32)         # X.view(K, -1), host-side
    d_flat = x_flat.shape[1]
    d_pad = _rup(d_flat, 8)

    # K-block size: sublane-aligned, bounded so per-step VMEM stays tiny even
    # for training-sized batches (respects v7x's smaller VMEM ceiling).
    tk = _rup(min(block_k, _rup(K, 8)), 8)
    k_pad = _rup(K, tk)

    # Pad batch rows and flattened features with zeros (sliced away below).
    x_pad = jnp.zeros((k_pad, d_pad), jnp.float32).at[:K, :d_flat].set(x_flat)

    rows = _slab_offsets(d_flat)[-1]
    assert slab.shape == (rows, LANE), (slab.shape, rows)

    grid = (k_pad // tk,)
    flops = 2 * k_pad * (d_pad * HID1 + HID1 * LANE + HID2 * LANE)
    bytes_accessed = 4 * (slab.size + x_pad.size + k_pad * LANE)

    kernel = functools.partial(sxs_dqn_kernel, d_pad=d_pad)
    out_pad = pl.pallas_call(
        kernel,
        out_shape=jax.ShapeDtypeStruct((k_pad, LANE), jnp.float32),
        grid=grid,
        in_specs=[
            pl.BlockSpec((tk, d_pad), lambda i: (i, 0)),     # x: per-block pipelined
            pl.BlockSpec((rows, LANE), lambda i: (0, 0)),    # slab: DMA once, resident
        ],
        out_specs=pl.BlockSpec((tk, LANE), lambda i: (i, 0)),
        compiler_params=pltpu.CompilerParams(
            dimension_semantics=("parallel",)),              # 2 TCs on v7x split K
        cost_estimate=pl.CostEstimate(flops=flops, transcendentals=0,
                                      bytes_accessed=bytes_accessed),
    )(x_pad, slab)
    return out_pad[:K, :dim_action]


# ------------------------- parameter initialization -------------------------

def init_params(key, number_of_node, dim_input, dim_action):
    """Matches nn.Linear default init ranges; weights stored as [in, out]."""
    d_flat = number_of_node * dim_input
    ks = jax.random.split(key, 6)

    def linear(kw, kb, fan_in, fan_out):
        lim = 1.0 / (fan_in ** 0.5)
        w = jax.random.uniform(kw, (fan_in, fan_out), jnp.float32, -lim, lim)
        b = jax.random.uniform(kb, (fan_out,), jnp.float32, -lim, lim)
        return w, b

    fc1_w, fc1_b = linear(ks[0], ks[1], d_flat, HID1)
    fc2_w, fc2_b = linear(ks[2], ks[3], HID1, HID2)
    out_w, out_b = linear(ks[4], ks[5], HID2, dim_action)
    return dict(fc1_w=fc1_w, fc1_b=fc1_b,
                fc2_w=fc2_w, fc2_b=fc2_b,
                out_w=out_w, out_b=out_b)


# --------------------------- pure-JAX reference -----------------------------

def reference_forward(x, adj, p):
    del adj  # unused, exactly as in the PyTorch module
    K = x.shape[0]
    h = x.reshape(K, -1)
    h = jax.nn.relu(h @ p['fc1_w'] + p['fc1_b'])
    h = jax.nn.relu(h @ p['fc2_w'] + p['fc2_b'])
    return h @ p['out_w'] + p['out_b']


if __name__ == "__main__":
    key = jax.random.PRNGKey(0)
    K, N, D_IN, A = 2, 8, 4, 36        # batch, nodes, features, dim_action

    kx, kadj, kp = jax.random.split(key, 3)
    x = jax.random.normal(kx, (K, N, D_IN), jnp.float32)
    adj = (jax.random.uniform(kadj, (N, N)) > 0.5).astype(jnp.float32)
    adj = jnp.maximum(adj, jnp.eye(N, dtype=jnp.float32))   # unused by forward

    params = init_params(kp, N, D_IN, A)
    slab = pack_params(params, N * D_IN)

    out = jax.block_until_ready(sxs_dqn(x, adj, slab, A))
    ref = reference_forward(x, adj, params)
    assert out.shape == (K, A), out.shape
    assert jnp.allclose(out, ref, atol=1e-4, rtol=1e-4), (out, ref)

    # Also exercise the multi-step K-grid path (slab resident across steps,
    # ragged K padded to the block size).
    K2 = 20
    x2 = jax.random.normal(jax.random.PRNGKey(1), (K2, N, D_IN), jnp.float32)
    out2 = jax.block_until_ready(sxs_dqn(x2, adj, slab, A, block_k=8))
    ref2 = reference_forward(x2, adj, params)
    assert out2.shape == (K2, A), out2.shape
    assert jnp.allclose(out2, ref2, atol=1e-4, rtol=1e-4), (out2, ref2)

    print("KERNEL_OK")
</pallas_src>

<mosaic_0001>
module attributes {stable_mosaic.version = 11 : i64} {
  func.func @sxs_dqn_kernel(%arg0: i32, %arg1: memref<8x32xf32, #tpu.memory_space<vmem>>, %arg2: memref<248x128xf32, #tpu.memory_space<vmem>>, %arg3: memref<8x128xf32, #tpu.memory_space<vmem>>) attributes {dimension_semantics = [#tpu.dimension_semantics<parallel>], iteration_bounds = array<i64: 1>, scalar_prefetch = 0 : i64, scratch_operands = 0 : i64, tpu.core_type = #tpu.core_type<tc>, window_params = [{transform_indices = @transform_0, window_bounds = array<i64: 8, 32>}, {pipeline_mode = #tpu.pipeline_mode<synchronous>, transform_indices = @transform_1, window_bounds = array<i64: 248, 128>}, {transform_indices = @transform_2, window_bounds = array<i64: 8, 128>}]} {
    %c0 = arith.constant 0 : index
    %c0_0 = arith.constant 0 : index
    %0 = vector.load %arg1[%c0, %c0_0] : memref<8x32xf32, #tpu.memory_space<vmem>>, vector<8x32xf32>
    %c0_1 = arith.constant 0 : index
    %c0_2 = arith.constant 0 : index
    %1 = vector.load %arg2[%c0_1, %c0_2] : memref<248x128xf32, #tpu.memory_space<vmem>>, vector<32x128xf32>
    %c32 = arith.constant 32 : index
    %c0_3 = arith.constant 0 : index
    %2 = vector.load %arg2[%c32, %c0_3] : memref<248x128xf32, #tpu.memory_space<vmem>>, vector<1x128xf32>
    %cst = arith.constant dense<0.000000e+00> : vector<8x128xf32>
    %3 = tpu.matmul %0, %1, %cst {dimension_numbers = #tpu.dot_dimension_numbers<[1], [0], [0], [1], [0, 0, 1, 1], [], []>} : vector<8x32xf32>, vector<32x128xf32>, vector<8x128xf32> -> vector<8x128xf32>
    %4 = vector.broadcast %2 : vector<1x128xf32> to vector<8x128xf32>
    %5 = arith.addf %3, %4 : vector<8x128xf32>
    %cst_4 = arith.constant 0.000000e+00 : f32
    %6 = vector.broadcast %cst_4 : f32 to vector<8x128xf32>
    %7 = arith.maximumf %5, %6 : vector<8x128xf32>
    %c40 = arith.constant 40 : index
    %c0_5 = arith.constant 0 : index
    %8 = vector.load %arg2[%c40, %c0_5] : memref<248x128xf32, #tpu.memory_space<vmem>>, vector<128x128xf32>
    %c168 = arith.constant 168 : index
    %c0_6 = arith.constant 0 : index
    %9 = vector.load %arg2[%c168, %c0_6] : memref<248x128xf32, #tpu.memory_space<vmem>>, vector<1x128xf32>
    %cst_7 = arith.constant dense<0.000000e+00> : vector<8x128xf32>
    %10 = tpu.matmul %7, %8, %cst_7 {dimension_numbers = #tpu.dot_dimension_numbers<[1], [0], [0], [1], [0, 0, 1, 1], [], []>} : vector<8x128xf32>, vector<128x128xf32>, vector<8x128xf32> -> vector<8x128xf32>
    %11 = vector.broadcast %9 : vector<1x128xf32> to vector<8x128xf32>
    %12 = arith.addf %10, %11 : vector<8x128xf32>
    %cst_8 = arith.constant 0.000000e+00 : f32
    %13 = vector.broadcast %cst_8 : f32 to vector<8x128xf32>
    %14 = arith.maximumf %12, %13 : vector<8x128xf32>
    %c176 = arith.constant 176 : index
    %c0_9 = arith.constant 0 : index
    %15 = vector.load %arg2[%c176, %c0_9] : memref<248x128xf32, #tpu.memory_space<vmem>>, vector<64x128xf32>
    %c240 = arith.constant 240 : index
    %c0_10 = arith.constant 0 : index
    %16 = vector.load %arg2[%c240, %c0_10] : memref<248x128xf32, #tpu.memory_space<vmem>>, vector<1x128xf32>
    %17 = vector.extract_strided_slice %14 {offsets = [0, 0], sizes = [8, 64], strides = [1, 1]} : vector<8x128xf32> to vector<8x64xf32>
    %cst_11 = arith.constant dense<0.000000e+00> : vector<8x128xf32>
    %18 = tpu.matmul %17, %15, %cst_11 {dimension_numbers = #tpu.dot_dimension_numbers<[1], [0], [0], [1], [0, 0, 1, 1], [], []>} : vector<8x64xf32>, vector<64x128xf32>, vector<8x128xf32> -> vector<8x128xf32>
    %19 = vector.broadcast %16 : vector<1x128xf32> to vector<8x128xf32>
    %20 = arith.addf %18, %19 : vector<8x128xf32>
    %c0_12 = arith.constant 0 : index
    %c0_13 = arith.constant 0 : index
    %21 = vector.load %arg3[%c0_12, %c0_13] : memref<8x128xf32, #tpu.memory_space<vmem>>, vector<8x128xf32>
    tpu.vector_store %arg3[%c0_12, %c0_13], %20 {strides = array<i32>} : memref<8x128xf32, #tpu.memory_space<vmem>>, vector<8x128xf32>,
    return
  }
  func.func @transform_0(%arg0: i32) -> (i32, i32) {
    %c0_i32 = arith.constant 0 : i32
    %c0_i32_0 = arith.constant 0 : i32
    return %arg0, %c0_i32 : i32, i32
  }
  func.func @transform_1(%arg0: i32) -> (i32, i32) {
    %c0_i32 = arith.constant 0 : i32
    %c0_i32_0 = arith.constant 0 : i32
    %c0_i32_1 = arith.constant 0 : i32
    return %c0_i32, %c0_i32_0 : i32, i32
  }
  func.func @transform_2(%arg0: i32) -> (i32, i32) {
    %c0_i32 = arith.constant 0 : i32
    %c0_i32_0 = arith.constant 0 : i32
    return %arg0, %c0_i32 : i32, i32
  }
}

</mosaic_0001>

<bundles_post_ra>
// kernel: tpu_custom_call.1
= control target key start
LH: loop header
LB: loop body
LE: loop exit
PB: predicated region body
PF: predicated region fallthrough
CT: control target
= control target key end

     0   :  { %7 = vsyncpa [#allocation3], 0  ;;  %s558_s0 = inlined_call_operand.hbm [shape: f32[8,32], index: 0, kind: input, shape index: {}]   ;;  %s559_s1 = inlined_call_operand.hbm [shape: f32[248,128], index: 1, kind: input, shape index: {}]   ;;  %s560_s2 = inlined_call_operand.hbm [shape: f32[8,128], index: 2, kind: output, shape index: {}]  }
   0x1   :  { %8 = vsyncpa [#allocation6], 0 }
   0x2   :  { %9 = vsyncpa [#allocation4], 0  ;;  %s493_s9 = smov [#allocation2]   ;;  %s494_s11 = smov [#allocation5]  }
   0x3   :  { %s16_s10 = sshll.u32 %s493_s9, 4  ;;  %s25_s12 = sshll.u32 %s494_s11, 4  ;;  %s17_s10 = int_to_ptr.vmem [resolvable:$true] %s16_s10  ;;  %s26_s12 = int_to_ptr.vmem [resolvable:$true] %s25_s12 }
   0x4   :  { %s435_s13 = scalar_lea.vmem %s17_s10, 128  ;;  %p440_p1 = scmp.lt.s32.totalorder %s17_s10, %s17_s10 }
   0x5   :  { %p436_p0 = scmp.ne.s32.totalorder %s17_s10, %s435_s13  ;;  %p441_p2 = scmp.lt.s32.totalorder %s435_s13, %s435_s13 }
   0x7   :  { %p442_p3 = por %p441_p2, %p440_p1 }
   0x9   :  { %p443_p4 = pnand %p442_p3, %p436_p0 }
   0xb   :  { %446 = shalt.err (!%p443_p4)
}
   0xc   :  { %19 = dma.hbm_to_vmem [thread:$0]  %s558_s0, 128, %s17_s10, [#allocation3]  }
   0xd   :  { %s455_s16 = scalar_lea.vmem %s26_s12, 3968  ;;  %p460_p6 = scmp.lt.s32.totalorder %s26_s12, %s26_s12 }
   0xe   :  { %p456_p5 = scmp.ne.s32.totalorder %s26_s12, %s455_s16  ;;  %p461_p7 = scmp.lt.s32.totalorder %s455_s16, %s455_s16 }
  0x10   :  { %p462_p8 = por %p461_p7, %p460_p6 }
  0x12   :  { %p463_p9 = pnand %p462_p8, %p456_p5 }
  0x14   :  { %466 = shalt.err (!%p463_p9)
}
  0x15   :  { %s495_s17 = smov 128   ;;  %s496_s18 = smov 8  }
  0x16   :  { %31 = dma.hbm_to_vmem [thread:$0]  %s559_s1, 3968, %s26_s12, [#allocation6], %s495_s17, %s495_s17, %s496_s18  }
  0x17   :  { %487 = dma.done.wait [#allocation3], 128  }
  0x18   :  { %488 = vsyncadd [#allocation3], 4294967168 }
  0x19   :  { %489 = dma.done.wait [#allocation6], 3968  }
  0x1a   :  { %490 = vsyncadd [#allocation6], 4294963328  ;;  %v497_v0 = vmov 0.0   ;;  %vm498_vm0 = vmmov 0   ;;  %v42_v1 = vld [vmem:[#allocation5 + $0x18] sm:$0xff]  ;;  %v41_v2 = vld [vmem:[#allocation5 + $0x10] sm:$0xff] }
  0x1b   :  { %355 = vmatprep.subr.mxu0 %v497_v0  ;;  %363 = vmatprep.mubr.msk.f32.mxu0 %vm498_vm0, %v497_v0  ;;  %v138_v3 = vld [vmem:[#allocation5 + $0xa0] sm:$0xff]  ;;  %v40_v4 = vld [vmem:[#allocation5 + $0x8] sm:$0xff]  ;;  %v137_v5 = vld [vmem:[#allocation5 + $0x98] sm:$0xff]  ;;  %vm48_vm1 = vcmask 261120   ;;  %vm228_vm2 = vcmask 523264   ;;  %s499_s0 = smov [#allocation7]  }
  0x1c   :  { %366 = vmatprep.subr.mxu1 %v497_v0  ;;  %398 = vmatprep.mubr.msk.f32.mxu1 %vm498_vm0, %v497_v0  ;;  %v136_v6 = vld [vmem:[#allocation5 + $0x90] sm:$0xff]  ;;  %v39_v7 = vld [vmem:[#allocation5] sm:$0xff]  ;;  %v38_v8 = vld [vmem:[#allocation2] sm:$0xff]  ;;  %s309_s1 = sshll.u32 %s499_s0, 4  ;;  %s310_s1 = int_to_ptr.vmem [resolvable:$true] %s309_s1 }
  0x1d   :  { %356 = vmatpush3.msra.mxu0 %v42_v1  ;;  %367 = vmatpush3.msra.mxu1 %v138_v3  ;;  %v135_v9 = vld [vmem:[#allocation5 + $0x88] sm:$0xff]  ;;  %v134_v10 = vld [vmem:[#allocation5 + $0x80] sm:$0xff]  ;;  %v133_v11 = vld [vmem:[#allocation5 + $0x78] sm:$0xff]  ;;  %s467_s21 = scalar_lea.vmem %s310_s1, 128  ;;  %p472_p11 = scmp.lt.s32.totalorder %s310_s1, %s310_s1 }
  0x1e   :  { %357 = vmatprep.subr.mxu0 %v497_v0  ;;  %368 = vmatprep.subr.mxu1 %v497_v0  ;;  %v132_v12 = vld [vmem:[#allocation5 + $0x70] sm:$0xff]  ;;  %v131_v13 = vld [vmem:[#allocation5 + $0x68] sm:$0xff]  ;;  %v130_v14 = vld [vmem:[#allocation5 + $0x60] sm:$0xff]  ;;  %p468_p10 = scmp.ne.s32.totalorder %s310_s1, %s467_s21  ;;  %p473_p12 = scmp.lt.s32.totalorder %s467_s21, %s467_s21 }
  0x1f   :  { %358 = vmatpush3.msra.mxu0 %v41_v2  ;;  %369 = vmatpush3.msra.mxu1 %v137_v5  ;;  %v129_v15 = vld [vmem:[#allocation5 + $0x58] sm:$0xff]  ;;  %v128_v16 = vld [vmem:[#allocation5 + $0x50] sm:$0xff]  ;;  %v127_v17 = vld [vmem:[#allocation5 + $0x48] sm:$0xff] }
  0x20   :  { %359 = vmatprep.subr.mxu0 %v497_v0  ;;  %370 = vmatprep.subr.mxu1 %v497_v0  ;;  %v126_v18 = vld [vmem:[#allocation5 + $0x40] sm:$0xff]  ;;  %v125_v19 = vld [vmem:[#allocation5 + $0x38] sm:$0xff]  ;;  %v124_v20 = vld [vmem:[#allocation5 + $0x30] sm:$0xff]  ;;  %p474_p13 = por %p473_p12, %p472_p11 }
  0x21   :  { %360 = vmatpush3.msra.mxu0 %v40_v4  ;;  %371 = vmatpush3.msra.mxu1 %v136_v6  ;;  %v123_v21 = vld [vmem:[#allocation5 + $0x28] sm:$0xff]  ;;  %v221_v23 = vld [vmem:[#allocation5 + $0xe0] sm:$0xff]  ;;  %v220_v24 = vld [vmem:[#allocation5 + $0xd8] sm:$0xff] }
  0x22   :  { %361 = vmatprep.subr.mxu0 %v497_v0  ;;  %372 = vmatprep.subr.mxu1 %v497_v0  ;;  %v222_v22 = vld [vmem:[#allocation5 + $0xe8] sm:$0xff]  ;;  %v219_v25 = vld [vmem:[#allocation5 + $0xd0] sm:$0xff]  ;;  %v319_v27 = vld [vmem:[#allocation5 + $0x20] ss:$0 sm:$0xff]  ;;  %p475_p0 = pnand %p474_p13, %p468_p10 }
  0x23   :  { %362 = vmatpush3.msra.mxu0 %v39_v7  ;;  %373 = vmatpush3.msra.mxu1 %v135_v9  ;;  %v218_v26 = vld [vmem:[#allocation5 + $0xc8] sm:$0xff]  ;;  %v217_v32 = vld [vmem:[#allocation5 + $0xc0] sm:$0xff]  ;;  %v216_v33 = vld [vmem:[#allocation5 + $0xb8] sm:$0xff] }
  0x24   :  { %364 = vmatmul.mubr.msk.f32.vlgmr.msra.gmra.mxu0 %vm48_vm1, %v38_v8  ;;  %374 = vmatprep.subr.mxu1 %v497_v0  ;;  %v215_v34 = vld [vmem:[#allocation5 + $0xb0] sm:$0xff]  ;;  %v321_v35 = vld [vmem:[#allocation5 + $0xa8] ss:$0 sm:$0xff] }
  0x25   :  { %401 = vmatprep.subr.mxu0 %v497_v0  ;;  %375 = vmatpush3.msra.mxu1 %v134_v10  ;;  %v322_v40 = vld [vmem:[#allocation5 + $0xf0] ss:$0 sm:$0xff] }
  0x26   :  { %417 = vmatprep.mubr.msk.f32.mxu0 %vm498_vm0, %v497_v0  ;;  %376 = vmatprep.subr.mxu1 %v497_v0 }
  0x27   :  { %377 = vmatpush3.msra.mxu1 %v133_v11  ;;  %402 = vmatpush3.msra.mxu0 %v222_v22 }
  0x28   :  { %378 = vmatprep.subr.mxu1 %v497_v0  ;;  %403 = vmatprep.subr.mxu0 %v497_v0 }
  0x29   :  { %379 = vmatpush3.msra.mxu1 %v132_v12  ;;  %404 = vmatpush3.msra.mxu0 %v221_v23 }
  0x2a   :  { %380 = vmatprep.subr.mxu1 %v497_v0  ;;  %405 = vmatprep.subr.mxu0 %v497_v0 }
  0x2b   :  { %381 = vmatpush3.msra.mxu1 %v131_v13  ;;  %406 = vmatpush3.msra.mxu0 %v220_v24 }
  0x2c   :  { %382 = vmatprep.subr.mxu1 %v497_v0  ;;  %407 = vmatprep.subr.mxu0 %v497_v0 }
  0x2d   :  { %383 = vmatpush3.msra.mxu1 %v130_v14  ;;  %408 = vmatpush3.msra.mxu0 %v219_v25 }
  0x2e   :  { %384 = vmatprep.subr.mxu1 %v497_v0  ;;  %409 = vmatprep.subr.mxu0 %v497_v0 }
  0x2f   :  { %385 = vmatpush3.msra.mxu1 %v129_v15  ;;  %410 = vmatpush3.msra.mxu0 %v218_v26 }
  0x30   :  { %386 = vmatprep.subr.mxu1 %v497_v0  ;;  %411 = vmatprep.subr.mxu0 %v497_v0 }
  0x31   :  { %387 = vmatpush3.msra.mxu1 %v128_v16  ;;  %412 = vmatpush3.msra.mxu0 %v217_v32 }
  0x32   :  { %388 = vmatprep.subr.mxu1 %v497_v0  ;;  %413 = vmatprep.subr.mxu0 %v497_v0 }
  0x33   :  { %389 = vmatpush3.msra.mxu1 %v127_v17  ;;  %414 = vmatpush3.msra.mxu0 %v216_v33 }
  0x34   :  { %390 = vmatprep.subr.mxu1 %v497_v0  ;;  %415 = vmatprep.subr.mxu0 %v497_v0 }
  0x35   :  { %391 = vmatpush3.msra.mxu1 %v126_v18  ;;  %416 = vmatpush3.msra.mxu0 %v215_v34 }
  0x36   :  { %392 = vmatprep.subr.mxu1 %v497_v0 }
  0x37   :  { %393 = vmatpush3.msra.mxu1 %v125_v19 }
  0x38   :  { %394 = vmatprep.subr.mxu1 %v497_v0 }
  0x39   :  { %395 = vmatpush3.msra.mxu1 %v124_v20 }
  0x3a   :  { %396 = vmatprep.subr.mxu1 %v497_v0 }
  0x3b   :  { %397 = vmatpush3.msra.mxu1 %v123_v21 }
  0xe4   :  { %v118_v28 = vpop.f32.mrf.mxu0 }
  0xe5   :  { %v119_v29 = vadd.f32 %v319_v27, %v118_v28 }
  0xe6   :  { %v365_v30 = vpop.f32.mrf.mxu0 }
  0xe7   :  { %v122_v31 = vmax.f32 %v119_v29, 0.0 }
  0xe9   :  { %399 = vmatmul.mubr.f32.vlgmr.msra.gmra.mxu1 %v122_v31 }
 0x1a9   :  { %v210_v36 = vpop.f32.mrf.mxu1 }
 0x1aa   :  { %v211_v37 = vadd.f32 %v321_v35, %v210_v36 }
 0x1ab   :  { %v400_v38 = vpop.f32.mrf.mxu1 }
 0x1ac   :  { %v214_v39 = vmax.f32 %v211_v37, 0.0 }
 0x1ae   :  { %418 = vmatmul.mubr.msk.f32.vlgmr.msra.gmra.mxu0 %vm228_vm2, %v214_v39 }
 0x26e   :  { %v298_v41 = vpop.f32.mrf.mxu0 }
 0x26f   :  { %v299_v42 = vadd.f32 %v322_v40, %v298_v41 }
 0x270   :  { %v419_v43 = vpop.f32.mrf.mxu0 }
 0x271   :  { %302 = vst [vmem:[#allocation7] sm:$0xff] %v299_v42 }
 0x272   :  { %478 = shalt.err (!%p475_p0)
}
 0x273   :  { %312 = dma.vmem_to_hbm [thread:$0]  %s310_s1, 128, %s560_s2, [#allocation4]  }
 0x274   :  { %491 = dma.done.wait [#allocation4], 128  }
 0x275   :  { %492 = vsyncadd [#allocation4], 4294967168 }
 0x276   :  { %316 = vsyncpa [#allocation3], 1 }
 0x277   :  { %317 = vsyncpa [#allocation6], 1 }
 0x278   :  { %318 = vsyncpa [#allocation4], 1 }

</bundles_post_ra>
